<compile_context>
chip_gen: v6e
topology: v6e:2x2x1
jax: 0.10.0
libtpu: 0.0.40
codegen_flags: <defaults>
</compile_context>

<pallas_src>
import functools

import jax
import jax.numpy as jnp
from jax.experimental import pallas as pl
from jax.experimental.pallas import tpu as pltpu


# ---------------------------------------------------------------------------
# Kernel
# ---------------------------------------------------------------------------
def _pool_att_ff_kernel(x_ref, w1t_ref, b1_ref, w2_ref, w3t_ref, b3_ref, o_ref, *,
                        seq_len):
    f32 = jnp.float32
    x = x_ref[...]                                   # [bt*T, D] rows of bt batch elems
    rows = x.shape[0]
    bt = rows // seq_len                             # static python int

    # ---- linear1 + ReLU (dropout = identity at inference); bf16 MXU, f32 accum.
    h = jnp.dot(x, w1t_ref[...], preferred_element_type=f32)            # [rows, H]
    h = jnp.maximum(h + b1_ref[...].astype(f32), 0.0)

    # ---- linear2 -> one lane-dense row of attention logits.
    #      (b2 dropped: softmax is shift-invariant, scalar bias cancels exactly.)
    logits = jax.lax.dot_general(
        w2_ref[...].astype(f32), h,
        dimension_numbers=(((1,), (1,)), ((), ())),
        preferred_element_type=f32)                                      # [1, rows]

    # ---- per-batch softmax over its own T columns, as a block-diagonal masked
    #      softmax so everything stays 2-D / lane-dense (no in-kernel reshapes).
    #      bt is capped <= H in the wrapper so these [bt, rows] temps stay small.
    col = jax.lax.broadcasted_iota(jnp.int32, (bt, rows), 1)
    seg = jax.lax.broadcasted_iota(jnp.int32, (bt, rows), 0) * seq_len
    in_seg = (col >= seg) & (col < seg + seq_len)                        # [bt, rows]
    masked = jnp.where(in_seg, logits, -jnp.inf)                         # bcast [1,rows]

    m = jnp.max(masked, axis=-1, keepdims=True)                          # [bt, 1]
    e = jnp.exp(masked - m)                                              # 0 off-segment
    s = jnp.sum(e, axis=-1, keepdims=True)                               # [bt, 1]
    att = e * pl.reciprocal(s, approx=True)      # EUP vrcp; fine for a softmax denom

    # ---- attention pooling and linear3, both dense MXU matmuls.
    #      NOTE: att is quantized to the x dtype (bf16) before the pooling matmul;
    #      accumulation stays f32 — acceptable for inference.
    pooled = jnp.dot(att.astype(x.dtype), x, preferred_element_type=f32)        # [bt, D]
    w3t = w3t_ref[...]
    out = jnp.dot(pooled.astype(w3t.dtype), w3t, preferred_element_type=f32)    # [bt, out]
    o_ref[...] = (out + b3_ref[...].astype(f32)).astype(o_ref.dtype)


# ---------------------------------------------------------------------------
# Hardware-aware helpers
# ---------------------------------------------------------------------------
def _tpu_vmem_capacity_bytes():
    try:
        info = pltpu.get_tpu_info()
        cap = getattr(info, "vmem_capacity_bytes", None)
        if isinstance(cap, int) and cap > 0:
            return cap
    except Exception:
        pass
    return 64 << 20          # conservative default (v7x-sized VMEM)


def _num_tensorcores():
    """TensorCores per chip (2 on v7x / v5p / v4 megacore, else 1)."""
    try:
        kind = str(jax.devices()[0].device_kind).lower()
        if ("v7" in kind) or ("v5p" in kind) or ("v4" in kind):
            return 2
    except Exception:
        pass
    return 1


def _vmem_budget_and_limit():
    cap = _tpu_vmem_capacity_bytes()
    # Leave headroom under physical VMEM; spend ~half the scoped limit on the
    # per-step working set (the x tile is double-buffered by the pipeline).
    limit = min(int(cap * 0.75), 96 << 20)    # ~96 MiB on v5e/v6e, ~48 MiB on v7x
    budget = limit // 2                       # ~48 MiB on v5e/v6e, ~24 MiB on v7x
    return budget, limit, cap


def _choose_block_b(B, T, D, H, out_size, x_itemsize, w_itemsize,
                    num_cores, vmem_budget):
    """Pick how many batch elements to process per grid step (and its footprint)."""
    row_align = max(8, 32 // x_itemsize)      # sublane packing: 8 (f32) / 16 (bf16)

    def legal(bt):
        if B % bt != 0:
            return False
        rows = bt * T
        rows_ok = (rows == B * T) or (rows % row_align == 0)   # bf16-aware
        out_ok = (bt == B) or (bt % 8 == 0)                    # output block is f32
        return rows_ok and out_ok

    def footprint(bt):
        rows = bt * T
        return (2 * rows * D * x_itemsize                      # double-buffered x tile
                + 4 * rows * H                                  # f32 linear1 activations
                + 4 * 4 * bt * rows                             # f32/i32 [bt,rows] softmax temps
                + 2 * ((D * H + D * out_size) * w_itemsize      # (double-buffered) weights
                       + (2 * H + out_size) * 4)                #   + f32 biases / w2 row
                + 2 * bt * out_size * 4)                        # double-buffered output block

    all_legal = [bt for bt in range(1, B + 1) if legal(bt)]     # bt == B is always legal
    # Cap bt <= H: bounds the bt^2-scaling block-diagonal softmax/pool work & VMEM.
    capped = [bt for bt in all_legal if bt <= H] or all_legal

    fitting = [bt for bt in capped if footprint(bt) <= vmem_budget]
    if not fitting:
        bt = min(capped)
        return bt, footprint(bt)              # caller raises vmem_limit / errors early

    if num_cores >= 2:
        # v7x: prefer >= 2 grid steps per TensorCore so the x DMA overlaps compute.
        for min_steps in (2 * num_cores, num_cores):
            good = [bt for bt in fitting if B // bt >= min_steps]
            if good:
                bt = max(good)
                return bt, footprint(bt)
    # Single-TC chips (v5e/v6e): largest legal tile; splitting only adds overhead.
    bt = max(fitting)
    return bt, footprint(bt)


# ---------------------------------------------------------------------------
# Wrapper
# ---------------------------------------------------------------------------
def pool_att_ff(x, w1, b1, w2, b2, w3, b3, *, block_b=None,
                compute_dtype=jnp.bfloat16):
    """x: [B, T, D]. Weights in PyTorch layout (W: [out, in]). Returns [B, out] f32."""
    B, T, D = x.shape
    H = w1.shape[0]
    out_size = w3.shape[0]
    del b2   # softmax is shift-invariant: linear2's scalar bias cancels exactly

    cdt = jnp.dtype(compute_dtype)

    # Cast / pre-transpose loop-invariant weights ONCE in the wrapper: no per-step
    # relayouts in-kernel, and the dominant HBM stream (x) is halved by bf16.
    x_flat = jnp.asarray(x).reshape(B * T, D).astype(cdt)
    w1t = jnp.asarray(w1).T.astype(cdt)                       # [D, H]
    w3t = jnp.asarray(w3).T.astype(cdt)                       # [D, out]
    w2_row = jnp.asarray(w2).reshape(1, H).astype(jnp.float32)
    b1_row = jnp.asarray(b1).reshape(1, H).astype(jnp.float32)
    b3_row = jnp.asarray(b3).reshape(1, out_size).astype(jnp.float32)

    vmem_budget, vmem_limit, vmem_cap = _vmem_budget_and_limit()
    num_cores = _num_tensorcores()

    if block_b is None:
        bt, fp = _choose_block_b(B, T, D, H, out_size, cdt.itemsize, cdt.itemsize,
                                 num_cores, vmem_budget)
    else:
        bt, fp = int(block_b), None
    assert B % bt == 0, (B, bt)
    rows = bt * T

    if fp is not None:
        # Make sure the scoped-VMEM limit covers the chosen working set, and fail
        # early if even the smallest legal tile cannot fit on this chip.
        if fp > int(vmem_cap * 0.9):
            raise ValueError(
                f"PoolAttFF tile needs ~{fp} bytes of VMEM but the chip only has "
                f"{vmem_cap}; reduce T/D or pass a smaller block_b.")
        vmem_limit = max(vmem_limit, min(fp + (8 << 20), int(vmem_cap * 0.9)))

    kernel = functools.partial(_pool_att_ff_kernel, seq_len=T)

    def build(single_buffer_weights):
        def const_spec(shape):
            kwargs = {}
            if single_buffer_weights:
                # Constant-index blocks are never re-fetched; single-buffering
                # halves their VMEM footprint (matters most for prod D/H on v7x).
                kwargs["pipeline_mode"] = pl.Buffered(1)
            return pl.BlockSpec(shape, lambda i: (0, 0), **kwargs)

        grid_spec = pltpu.PrefetchScalarGridSpec(
            num_scalar_prefetch=0,
            grid=(B // bt,),
            in_specs=[
                pl.BlockSpec((rows, D), lambda i: (i, 0)),     # x rows for bt batches
                const_spec((D, H)),                            # W1^T (resident)
                const_spec((1, H)),                            # b1
                const_spec((1, H)),                            # W2 row
                const_spec((D, out_size)),                     # W3^T
                const_spec((1, out_size)),                     # b3
            ],
            out_specs=pl.BlockSpec((bt, out_size), lambda i: (i, 0)),
        )
        return pl.pallas_call(
            kernel,
            out_shape=jax.ShapeDtypeStruct((B, out_size), jnp.float32),
            grid_spec=grid_spec,
            compiler_params=pltpu.CompilerParams(
                dimension_semantics=("parallel",),
                vmem_limit_bytes=int(vmem_limit)),
        )

    args = (x_flat, w1t, b1_row, w2_row, w3t, b3_row)
    try:
        return jax.block_until_ready(build(True)(*args))
    except Exception:
        # pipeline_mode / pl.Buffered(1) not supported on this jax version:
        # fall back to default double-buffered (still correct) weight blocks.
        return jax.block_until_ready(build(False)(*args))


# ---------------------------------------------------------------------------
# Pure-JAX reference (mirrors the PyTorch forward; dropout = identity)
# ---------------------------------------------------------------------------
def pool_att_ff_ref(x, w1, b1, w2, b2, w3, b3):
    h = jax.nn.relu(jnp.einsum("btd,hd->bth", x, w1) + b1)     # [B,T,H]
    att = jnp.einsum("bth,oh->bto", h, w2) + b2                # [B,T,1]
    att = jax.nn.softmax(att[..., 0], axis=-1)                 # [B,T]
    pooled = jnp.einsum("bt,btd->bd", att, x)                  # [B,D]
    return pooled @ w3.T + b3                                  # [B,out]


if __name__ == "__main__":
    # Small, module-consistent shapes (d_input=64, h=32, output_size=1); batch big
    # enough to exercise batch tiling (bt=8 or 16 depending on core count).
    B, T, D, H, OUT = 16, 16, 64, 32, 1

    key = jax.random.PRNGKey(0)
    kx, k1, k2, k3, k4, k5, k6 = jax.random.split(key, 7)

    x = jax.random.normal(kx, (B, T, D), dtype=jnp.float32)

    def uinit(k, shape, fan_in):
        bound = 1.0 / float(fan_in) ** 0.5
        return jax.random.uniform(k, shape, jnp.float32, -bound, bound)

    w1 = uinit(k1, (H, D), D)
    b1 = uinit(k2, (H,), D)
    w2 = uinit(k3, (1, H), H)
    b2 = uinit(k4, (1,), H)
    w3 = uinit(k5, (OUT, D), D)
    b3 = uinit(k6, (OUT,), D)

    out = pool_att_ff(x, w1, b1, w2, b2, w3, b3)   # bf16 compute path, f32 accum
    out = jax.block_until_ready(out)

    ref = pool_att_ff_ref(x, w1, b1, w2, b2, w3, b3)
    assert out.shape == (B, OUT), out.shape
    # bf16 inputs/weights with f32 accumulation -> loose (but tight-enough) check.
    assert jnp.allclose(out, ref, atol=3e-2, rtol=3e-2), (out, ref)

    print("KERNEL_OK")
</pallas_src>

<mosaic_0001>
module attributes {stable_mosaic.version = 11 : i64} {
  func.func @_pool_att_ff_kernel(%arg0: i32, %arg1: memref<256x64xbf16, #tpu.memory_space<vmem>>, %arg2: memref<64x32xbf16, #tpu.memory_space<vmem>>, %arg3: memref<1x32xf32, #tpu.memory_space<vmem>>, %arg4: memref<1x32xf32, #tpu.memory_space<vmem>>, %arg5: memref<64x1xbf16, #tpu.memory_space<vmem>>, %arg6: memref<1x1xf32, #tpu.memory_space<vmem>>, %arg7: memref<16x1xf32, #tpu.memory_space<vmem>>) attributes {dimension_semantics = [#tpu.dimension_semantics<parallel>], iteration_bounds = array<i64: 1>, scalar_prefetch = 0 : i64, scratch_operands = 0 : i64, tpu.core_type = #tpu.core_type<tc>, window_params = [{transform_indices = @transform_0, window_bounds = array<i64: 256, 64>}, {pipeline_mode = #tpu.pipeline_mode<synchronous>, transform_indices = @transform_1, window_bounds = array<i64: 64, 32>}, {pipeline_mode = #tpu.pipeline_mode<synchronous>, transform_indices = @transform_2, window_bounds = array<i64: 1, 32>}, {pipeline_mode = #tpu.pipeline_mode<synchronous>, transform_indices = @transform_3, window_bounds = array<i64: 1, 32>}, {pipeline_mode = #tpu.pipeline_mode<synchronous>, transform_indices = @transform_4, window_bounds = array<i64: 64, 1>}, {pipeline_mode = #tpu.pipeline_mode<synchronous>, transform_indices = @transform_5, window_bounds = array<i64: 1, 1>}, {transform_indices = @transform_6, window_bounds = array<i64: 16, 1>}]} {
    %c0 = arith.constant 0 : index
    %c0_0 = arith.constant 0 : index
    %0 = vector.load %arg1[%c0, %c0_0] : memref<256x64xbf16, #tpu.memory_space<vmem>>, vector<256x64xbf16>
    %c0_1 = arith.constant 0 : index
    %c0_2 = arith.constant 0 : index
    %1 = vector.load %arg2[%c0_1, %c0_2] : memref<64x32xbf16, #tpu.memory_space<vmem>>, vector<64x32xbf16>
    %cst = arith.constant dense<0.000000e+00> : vector<256x32xf32>
    %2 = tpu.matmul %0, %1, %cst {dimension_numbers = #tpu.dot_dimension_numbers<[1], [0], [0], [1], [0, 0, 1, 1], [], []>} : vector<256x64xbf16>, vector<64x32xbf16>, vector<256x32xf32> -> vector<256x32xf32>
    %c0_3 = arith.constant 0 : index
    %c0_4 = arith.constant 0 : index
    %3 = vector.load %arg3[%c0_3, %c0_4] : memref<1x32xf32, #tpu.memory_space<vmem>>, vector<1x32xf32>
    %4 = vector.broadcast %3 : vector<1x32xf32> to vector<256x32xf32>
    %5 = arith.addf %2, %4 : vector<256x32xf32>
    %cst_5 = arith.constant 0.000000e+00 : f32
    %6 = vector.broadcast %cst_5 : f32 to vector<256x32xf32>
    %7 = arith.maximumf %5, %6 : vector<256x32xf32>
    %c0_6 = arith.constant 0 : index
    %c0_7 = arith.constant 0 : index
    %8 = vector.load %arg4[%c0_6, %c0_7] : memref<1x32xf32, #tpu.memory_space<vmem>>, vector<1x32xf32>
    %cst_8 = arith.constant dense<0.000000e+00> : vector<1x256xf32>
    %9 = tpu.matmul %8, %7, %cst_8 {dimension_numbers = #tpu.dot_dimension_numbers<[1], [1], [0], [0], [0, 0, 1, 0], [], []>} : vector<1x32xf32>, vector<256x32xf32>, vector<1x256xf32> -> vector<1x256xf32>
    %10 = tpu.iota {dimensions = array<i32: 1>} : vector<16x256xi32>
    %11 = tpu.iota {dimensions = array<i32: 0>} : vector<16x256xi32>
    %c16_i32 = arith.constant 16 : i32
    %12 = vector.broadcast %c16_i32 : i32 to vector<16x256xi32>
    %13 = arith.muli %11, %12 : vector<16x256xi32>
    %14 = arith.cmpi sge, %10, %13 : vector<16x256xi32>
    %c16_i32_9 = arith.constant 16 : i32
    %15 = vector.broadcast %c16_i32_9 : i32 to vector<16x256xi32>
    %16 = arith.addi %13, %15 : vector<16x256xi32>
    %17 = arith.cmpi slt, %10, %16 : vector<16x256xi32>
    %18 = arith.andi %14, %17 : vector<16x256xi1>
    %cst_10 = arith.constant 0xFF800000 : f32
    %19 = vector.shape_cast %9 : vector<1x256xf32> to vector<1x256xf32>
    %20 = vector.broadcast %19 : vector<1x256xf32> to vector<16x256xf32>
    %21 = vector.broadcast %cst_10 : f32 to vector<16x256xf32>
    %22 = arith.select %18, %20, %21 : vector<16x256xi1>, vector<16x256xf32>
    %cst_11 = arith.constant dense<0xFF800000> : vector<16xf32>
    %23 = vector.multi_reduction <maximumf>, %22, %cst_11 [1] : vector<16x256xf32> to vector<16xf32>
    %24 = vector.shape_cast %23 : vector<16xf32> to vector<16x1xf32>
    %25 = vector.broadcast %24 : vector<16x1xf32> to vector<16x256xf32>
    %26 = arith.subf %22, %25 : vector<16x256xf32>
    %27 = math.exp %26 : vector<16x256xf32>
    %cst_12 = arith.constant dense<0.000000e+00> : vector<16xf32>
    %28 = vector.multi_reduction <add>, %27, %cst_12 [1] : vector<16x256xf32> to vector<16xf32>
    %29 = vector.shape_cast %28 : vector<16xf32> to vector<16x1xf32>
    %30 = tpu.reciprocal %29 {approx = true} : vector<16x1xf32> -> vector<16x1xf32>
    %31 = vector.broadcast %30 : vector<16x1xf32> to vector<16x256xf32>
    %32 = arith.mulf %27, %31 : vector<16x256xf32>
    %33 = arith.truncf %32 : vector<16x256xf32> to vector<16x256xbf16>
    %cst_13 = arith.constant dense<0.000000e+00> : vector<16x64xf32>
    %34 = tpu.matmul %33, %0, %cst_13 {dimension_numbers = #tpu.dot_dimension_numbers<[1], [0], [0], [1], [0, 0, 1, 1], [], []>} : vector<16x256xbf16>, vector<256x64xbf16>, vector<16x64xf32> -> vector<16x64xf32>
    %c0_14 = arith.constant 0 : index
    %c0_15 = arith.constant 0 : index
    %35 = vector.load %arg5[%c0_14, %c0_15] : memref<64x1xbf16, #tpu.memory_space<vmem>>, vector<64x1xbf16>
    %36 = arith.truncf %34 : vector<16x64xf32> to vector<16x64xbf16>
    %cst_16 = arith.constant dense<0.000000e+00> : vector<16x1xf32>
    %37 = tpu.matmul %36, %35, %cst_16 {dimension_numbers = #tpu.dot_dimension_numbers<[1], [0], [0], [1], [0, 0, 1, 1], [], []>} : vector<16x64xbf16>, vector<64x1xbf16>, vector<16x1xf32> -> vector<16x1xf32>
    %c0_17 = arith.constant 0 : index
    %c0_18 = arith.constant 0 : index
    %38 = vector.load %arg6[%c0_17, %c0_18] : memref<1x1xf32, #tpu.memory_space<vmem>>, vector<1x1xf32>
    %39 = vector.broadcast %38 : vector<1x1xf32> to vector<16x1xf32>
    %40 = arith.addf %37, %39 : vector<16x1xf32>
    %c0_19 = arith.constant 0 : index
    %c0_20 = arith.constant 0 : index
    %41 = vector.load %arg7[%c0_19, %c0_20] : memref<16x1xf32, #tpu.memory_space<vmem>>, vector<16x1xf32>
    tpu.vector_store %arg7[%c0_19, %c0_20], %40 {strides = array<i32>} : memref<16x1xf32, #tpu.memory_space<vmem>>, vector<16x1xf32>,
    return
  }
  func.func @transform_0(%arg0: i32) -> (i32, i32) {
    %c0_i32 = arith.constant 0 : i32
    %c0_i32_0 = arith.constant 0 : i32
    return %arg0, %c0_i32 : i32, i32
  }
  func.func @transform_1(%arg0: i32) -> (i32, i32) {
    %c0_i32 = arith.constant 0 : i32
    %c0_i32_0 = arith.constant 0 : i32
    %c0_i32_1 = arith.constant 0 : i32
    return %c0_i32, %c0_i32_0 : i32, i32
  }
  func.func @transform_2(%arg0: i32) -> (i32, i32) {
    %c0_i32 = arith.constant 0 : i32
    %c0_i32_0 = arith.constant 0 : i32
    %c0_i32_1 = arith.constant 0 : i32
    return %c0_i32, %c0_i32_0 : i32, i32
  }
  func.func @transform_3(%arg0: i32) -> (i32, i32) {
    %c0_i32 = arith.constant 0 : i32
    %c0_i32_0 = arith.constant 0 : i32
    %c0_i32_1 = arith.constant 0 : i32
    return %c0_i32, %c0_i32_0 : i32, i32
  }
  func.func @transform_4(%arg0: i32) -> (i32, i32) {
    %c0_i32 = arith.constant 0 : i32
    %c0_i32_0 = arith.constant 0 : i32
    %c0_i32_1 = arith.constant 0 : i32
    return %c0_i32, %c0_i32_0 : i32, i32
  }
  func.func @transform_5(%arg0: i32) -> (i32, i32) {
    %c0_i32 = arith.constant 0 : i32
    %c0_i32_0 = arith.constant 0 : i32
    %c0_i32_1 = arith.constant 0 : i32
    return %c0_i32, %c0_i32_0 : i32, i32
  }
  func.func @transform_6(%arg0: i32) -> (i32, i32) {
    %c0_i32 = arith.constant 0 : i32
    %c0_i32_0 = arith.constant 0 : i32
    return %arg0, %c0_i32 : i32, i32
  }
}

module attributes {stable_mosaic.version = 11 : i64} {
  func.func @_pool_att_ff_kernel(%arg0: i32, %arg1: memref<256x64xbf16, #tpu.memory_space<vmem>>, %arg2: memref<64x32xbf16, #tpu.memory_space<vmem>>, %arg3: memref<1x32xf32, #tpu.memory_space<vmem>>, %arg4: memref<1x32xf32, #tpu.memory_space<vmem>>, %arg5: memref<64x1xbf16, #tpu.memory_space<vmem>>, %arg6: memref<1x1xf32, #tpu.memory_space<vmem>>, %arg7: memref<16x1xf32, #tpu.memory_space<vmem>>) attributes {dimension_semantics = [#tpu.dimension_semantics<parallel>], iteration_bounds = array<i64: 1>, scalar_prefetch = 0 : i64, scratch_operands = 0 : i64, tpu.core_type = #tpu.core_type<tc>, window_params = [{transform_indices = @transform_0, window_bounds = array<i64: 256, 64>}, {pipeline_mode = #tpu.pipeline_mode<synchronous>, transform_indices = @transform_1, window_bounds = array<i64: 64, 32>}, {pipeline_mode = #tpu.pipeline_mode<synchronous>, transform_indices = @transform_2, window_bounds = array<i64: 1, 32>}, {pipeline_mode = #tpu.pipeline_mode<synchronous>, transform_indices = @transform_3, window_bounds = array<i64: 1, 32>}, {pipeline_mode = #tpu.pipeline_mode<synchronous>, transform_indices = @transform_4, window_bounds = array<i64: 64, 1>}, {pipeline_mode = #tpu.pipeline_mode<synchronous>, transform_indices = @transform_5, window_bounds = array<i64: 1, 1>}, {transform_indices = @transform_6, window_bounds = array<i64: 16, 1>}]} {
    %c0 = arith.constant 0 : index
    %c0_0 = arith.constant 0 : index
    %0 = vector.load %arg1[%c0, %c0_0] : memref<256x64xbf16, #tpu.memory_space<vmem>>, vector<256x64xbf16>
    %c0_1 = arith.constant 0 : index
    %c0_2 = arith.constant 0 : index
    %1 = vector.load %arg2[%c0_1, %c0_2] : memref<64x32xbf16, #tpu.memory_space<vmem>>, vector<64x32xbf16>
    %cst = arith.constant dense<0.000000e+00> : vector<256x32xf32>
    %2 = tpu.matmul %0, %1, %cst {dimension_numbers = #tpu.dot_dimension_numbers<[1], [0], [0], [1], [0, 0, 1, 1], [], []>} : vector<256x64xbf16>, vector<64x32xbf16>, vector<256x32xf32> -> vector<256x32xf32>
    %c0_3 = arith.constant 0 : index
    %c0_4 = arith.constant 0 : index
    %3 = vector.load %arg3[%c0_3, %c0_4] : memref<1x32xf32, #tpu.memory_space<vmem>>, vector<1x32xf32>
    %4 = vector.broadcast %3 : vector<1x32xf32> to vector<256x32xf32>
    %5 = arith.addf %2, %4 : vector<256x32xf32>
    %cst_5 = arith.constant 0.000000e+00 : f32
    %6 = vector.broadcast %cst_5 : f32 to vector<256x32xf32>
    %7 = arith.maximumf %5, %6 : vector<256x32xf32>
    %c0_6 = arith.constant 0 : index
    %c0_7 = arith.constant 0 : index
    %8 = vector.load %arg4[%c0_6, %c0_7] : memref<1x32xf32, #tpu.memory_space<vmem>>, vector<1x32xf32>
    %cst_8 = arith.constant dense<0.000000e+00> : vector<1x256xf32>
    %9 = tpu.matmul %8, %7, %cst_8 {dimension_numbers = #tpu.dot_dimension_numbers<[1], [1], [0], [0], [0, 0, 1, 0], [], []>} : vector<1x32xf32>, vector<256x32xf32>, vector<1x256xf32> -> vector<1x256xf32>
    %10 = tpu.iota {dimensions = array<i32: 1>} : vector<16x256xi32>
    %11 = tpu.iota {dimensions = array<i32: 0>} : vector<16x256xi32>
    %c16_i32 = arith.constant 16 : i32
    %12 = vector.broadcast %c16_i32 : i32 to vector<16x256xi32>
    %13 = arith.muli %11, %12 : vector<16x256xi32>
    %14 = arith.cmpi sge, %10, %13 : vector<16x256xi32>
    %c16_i32_9 = arith.constant 16 : i32
    %15 = vector.broadcast %c16_i32_9 : i32 to vector<16x256xi32>
    %16 = arith.addi %13, %15 : vector<16x256xi32>
    %17 = arith.cmpi slt, %10, %16 : vector<16x256xi32>
    %18 = arith.andi %14, %17 : vector<16x256xi1>
    %cst_10 = arith.constant 0xFF800000 : f32
    %19 = vector.shape_cast %9 : vector<1x256xf32> to vector<1x256xf32>
    %20 = vector.broadcast %19 : vector<1x256xf32> to vector<16x256xf32>
    %21 = vector.broadcast %cst_10 : f32 to vector<16x256xf32>
    %22 = arith.select %18, %20, %21 : vector<16x256xi1>, vector<16x256xf32>
    %cst_11 = arith.constant dense<0xFF800000> : vector<16xf32>
    %23 = vector.multi_reduction <maximumf>, %22, %cst_11 [1] : vector<16x256xf32> to vector<16xf32>
    %24 = vector.shape_cast %23 : vector<16xf32> to vector<16x1xf32>
    %25 = vector.broadcast %24 : vector<16x1xf32> to vector<16x256xf32>
    %26 = arith.subf %22, %25 : vector<16x256xf32>
    %27 = math.exp %26 : vector<16x256xf32>
    %cst_12 = arith.constant dense<0.000000e+00> : vector<16xf32>
    %28 = vector.multi_reduction <add>, %27, %cst_12 [1] : vector<16x256xf32> to vector<16xf32>
    %29 = vector.shape_cast %28 : vector<16xf32> to vector<16x1xf32>
    %30 = tpu.reciprocal %29 {approx = true} : vector<16x1xf32> -> vector<16x1xf32>
    %31 = vector.broadcast %30 : vector<16x1xf32> to vector<16x256xf32>
    %32 = arith.mulf %27, %31 : vector<16x256xf32>
    %33 = arith.truncf %32 : vector<16x256xf32> to vector<16x256xbf16>
    %cst_13 = arith.constant dense<0.000000e+00> : vector<16x64xf32>
    %34 = tpu.matmul %33, %0, %cst_13 {dimension_numbers = #tpu.dot_dimension_numbers<[1], [0], [0], [1], [0, 0, 1, 1], [], []>} : vector<16x256xbf16>, vector<256x64xbf16>, vector<16x64xf32> -> vector<16x64xf32>
    %c0_14 = arith.constant 0 : index
    %c0_15 = arith.constant 0 : index
    %35 = vector.load %arg5[%c0_14, %c0_15] : memref<64x1xbf16, #tpu.memory_space<vmem>>, vector<64x1xbf16>
    %36 = arith.truncf %34 : vector<16x64xf32> to vector<16x64xbf16>
    %cst_16 = arith.constant dense<0.000000e+00> : vector<16x1xf32>
    %37 = tpu.matmul %36, %35, %cst_16 {dimension_numbers = #tpu.dot_dimension_numbers<[1], [0], [0], [1], [0, 0, 1, 1], [], []>} : vector<16x64xbf16>, vector<64x1xbf16>, vector<16x1xf32> -> vector<16x1xf32>
    %c0_17 = arith.constant 0 : index
    %c0_18 = arith.constant 0 : index
    %38 = vector.load %arg6[%c0_17, %c0_18] : memref<1x1xf32, #tpu.memory_space<vmem>>, vector<1x1xf32>
    %39 = vector.broadcast %38 : vector<1x1xf32> to vector<16x1xf32>
    %40 = arith.addf %37, %39 : vector<16x1xf32>
    %c0_19 = arith.constant 0 : index
    %c0_20 = arith.constant 0 : index
    %41 = vector.load %arg7[%c0_19, %c0_20] : memref<16x1xf32, #tpu.memory_space<vmem>>, vector<16x1xf32>
    tpu.vector_store %arg7[%c0_19, %c0_20], %40 {strides = array<i32>} : memref<16x1xf32, #tpu.memory_space<vmem>>, vector<16x1xf32>,
    return
  }
  func.func @transform_0(%arg0: i32) -> (i32, i32) {
    %c0_i32 = arith.constant 0 : i32
    %c0_i32_0 = arith.constant 0 : i32
    return %arg0, %c0_i32 : i32, i32
  }
  func.func @transform_1(%arg0: i32) -> (i32, i32) {
    %c0_i32 = arith.constant 0 : i32
    %c0_i32_0 = arith.constant 0 : i32
    %c0_i32_1 = arith.constant 0 : i32
    return %c0_i32, %c0_i32_0 : i32, i32
  }
  func.func @transform_2(%arg0: i32) -> (i32, i32) {
    %c0_i32 = arith.constant 0 : i32
    %c0_i32_0 = arith.constant 0 : i32
    %c0_i32_1 = arith.constant 0 : i32
    return %c0_i32, %c0_i32_0 : i32, i32
  }
  func.func @transform_3(%arg0: i32) -> (i32, i32) {
    %c0_i32 = arith.constant 0 : i32
    %c0_i32_0 = arith.constant 0 : i32
    %c0_i32_1 = arith.constant 0 : i32
    return %c0_i32, %c0_i32_0 : i32, i32
  }
  func.func @transform_4(%arg0: i32) -> (i32, i32) {
    %c0_i32 = arith.constant 0 : i32
    %c0_i32_0 = arith.constant 0 : i32
    %c0_i32_1 = arith.constant 0 : i32
    return %c0_i32, %c0_i32_0 : i32, i32
  }
  func.func @transform_5(%arg0: i32) -> (i32, i32) {
    %c0_i32 = arith.constant 0 : i32
    %c0_i32_0 = arith.constant 0 : i32
    %c0_i32_1 = arith.constant 0 : i32
    return %c0_i32, %c0_i32_0 : i32, i32
  }
  func.func @transform_6(%arg0: i32) -> (i32, i32) {
    %c0_i32 = arith.constant 0 : i32
    %c0_i32_0 = arith.constant 0 : i32
    return %arg0, %c0_i32 : i32, i32
  }
}

</mosaic_0001>

<bundles_post_ra>
// kernel: tpu_custom_call.1
= control target key start
LH: loop header
LB: loop body
LE: loop exit
PB: predicated region body
PF: predicated region fallthrough
CT: control target
= control target key end

     0   :  { %vm177_vm0 = vcmask 523264   ;;  %vm420_vm1 = vcmask 261120   ;;  %vm1053_vm14 = vmmov 0   ;;  %vm798_vm15 = vcmask 7168   ;;  %s1313_s1 = inlined_call_operand.vmem [shape: bf16[64,32], index: 1, kind: input, shape index: {}]   ;;  %s1314_s0 = inlined_call_operand.vmem [shape: bf16[256,64], index: 0, kind: input, shape index: {}]   ;;  %s1315_s3 = inlined_call_operand.vmem [shape: f32[1,32], index: 3, kind: input, shape index: {}]   ;;  %s1316_s2 = inlined_call_operand.vmem [shape: f32[1,32], index: 2, kind: input, shape index: {}]   ;;  %s1317_s4 = inlined_call_operand.vmem [shape: bf16[64,1], index: 4, kind: input, shape index: {}]   ;;  %s1318_s5 = inlined_call_operand.<no memory space> [shape: f32[1,1], index: 5, kind: input, shape index: {}]   ;;  %s1319_s6 = inlined_call_operand.vmem [shape: f32[16,1], index: 6, kind: output, shape index: {}]  }
   0x1   :  { %v1016_v0 = vld [vmem:[%s1313_s1 + $0x18] sm:$0xff]   ;;  %v1017_v1 = vld [vmem:[%s1313_s1 + $0x10] sm:$0xff]   ;;  %v1018_v2 = vld [vmem:[%s1313_s1 + $0x8] sm:$0xff]  }
   0x2   :  { %962 = vmatprep.subr.bf16.mxu0 %v1016_v0  ;;  %v1020_v3 = vld [vmem:[%s1314_s0] sm:$0xff]   ;;  %v1021_v5 = vld [vmem:[%s1314_s0 + $0x8] sm:$0xff]   ;;  %v1022_v6 = vld [vmem:[%s1314_s0 + $0x10] sm:$0xff]  }
   0x3   :  { %963 = vmatpush3.bf16.msra.mxu0 %v1016_v0  ;;  %970 = vmatprep.mubr.msk.bf16.mxu0 %vm177_vm0, %v1020_v3  ;;  %v1019_v4 = vld [vmem:[%s1313_s1] sm:$0xff]   ;;  %v1035_v7 = vld [vmem:[%s1314_s0 + $0x78] sm:$0xff]   ;;  %v1034_v9 = vld [vmem:[%s1314_s0 + $0x70] sm:$0xff]  }
   0x4   :  { %964 = vmatprep.subr.bf16.mxu0 %v1017_v1  ;;  %v1027_v8 = vld [vmem:[%s1314_s0 + $0x38] sm:$0xff]   ;;  %v1024_v11 = vld [vmem:[%s1314_s0 + $0x20] sm:$0xff]   ;;  %v1026_v12 = vld [vmem:[%s1314_s0 + $0x30] sm:$0xff]  }
   0x5   :  { %v1023_v10 = vld [vmem:[%s1314_s0 + $0x18] sm:$0xff]   ;;  %v1033_v13 = vld [vmem:[%s1314_s0 + $0x68] sm:$0xff]   ;;  %v1032_v15 = vld [vmem:[%s1314_s0 + $0x60] sm:$0xff]  }
   0x6   :  { %v1025_v14 = vld [vmem:[%s1314_s0 + $0x28] sm:$0xff]   ;;  %v1031_v16 = vld [vmem:[%s1314_s0 + $0x58] sm:$0xff]   ;;  %v1030_v17 = vld [vmem:[%s1314_s0 + $0x50] sm:$0xff]  }
   0x7   :  { %965 = vmatpush3.bf16.msra.mxu0 %v1017_v1  ;;  %v1028_v18 = vld [vmem:[%s1314_s0 + $0x40] sm:$0xff]   ;;  %v1029_v19 = vld [vmem:[%s1314_s0 + $0x48] sm:$0xff]  }
   0x8   :  { %966 = vmatprep.subr.bf16.mxu0 %v1018_v2  ;;  %v1168_v20 = vld [vmem:[%s1315_s3] sm:$0x1] }
   0x9   :  { %933 = vmatprep.mubr.msk.f32.mxu1 %vm420_vm1, %v1168_v20  ;;  %v1207_v51 = vld [vmem:[%s1316_s2] ss:$0 sm:$0xff] }
   0xb   :  { %967 = vmatpush3.bf16.msra.mxu0 %v1018_v2 }
   0xc   :  { %968 = vmatprep.subr.bf16.mxu0 %v1019_v4 }
   0xf   :  { %969 = vmatpush3.bf16.msra.mxu0 %v1019_v4 }
  0x10   :  { %935 = vmatprep.subr.bf16.mxu0 %v1035_v7 }
  0x12   :  { %971 = vmatmul.mubr.msk.bf16.vlgmr.msra.gmra.mxu0 %vm177_vm0, %v1021_v5 }
  0x13   :  { %974 = vmatprep.mubr.msk.bf16.mxu0 %vm177_vm0, %v1022_v6  ;;  %936 = vmatpush3.bf16.msra.mxu0 %v1027_v8 }
  0x14   :  { %937 = vmatprep.subr.bf16.mxu0 %v1034_v9 }
  0x17   :  { %938 = vmatpush3.bf16.msra.mxu0 %v1026_v12 }
  0x18   :  { %939 = vmatprep.subr.bf16.mxu0 %v1033_v13 }
  0x1a   :  { %975 = vmatmul.mubr.msk.bf16.gmra.mxu0 %vm177_vm0, %v1023_v10 }
  0x1b   :  { %978 = vmatprep.mubr.msk.bf16.mxu0 %vm177_vm0, %v1024_v11  ;;  %940 = vmatpush3.bf16.msra.mxu0 %v1025_v14 }
  0x1c   :  { %941 = vmatprep.subr.bf16.mxu0 %v1032_v15 }
  0x1f   :  { %942 = vmatpush3.bf16.msra.mxu0 %v1024_v11 }
  0x20   :  { %943 = vmatprep.subr.bf16.mxu0 %v1031_v16 }
  0x22   :  { %979 = vmatmul.mubr.msk.bf16.gmra.mxu0 %vm177_vm0, %v1025_v14 }
  0x23   :  { %982 = vmatprep.mubr.msk.bf16.mxu0 %vm177_vm0, %v1026_v12  ;;  %944 = vmatpush3.bf16.msra.mxu0 %v1023_v10 }
  0x24   :  { %945 = vmatprep.subr.bf16.mxu0 %v1030_v17 }
  0x27   :  { %946 = vmatpush3.bf16.msra.mxu0 %v1022_v6 }
  0x28   :  { %947 = vmatprep.subr.bf16.mxu0 %v1029_v19 }
  0x2a   :  { %983 = vmatmul.mubr.msk.bf16.gmra.mxu0 %vm177_vm0, %v1027_v8 }
  0x2b   :  { %986 = vmatprep.mubr.msk.bf16.mxu0 %vm177_vm0, %v1028_v18  ;;  %948 = vmatpush3.bf16.msra.mxu0 %v1021_v5 }
  0x2c   :  { %949 = vmatprep.subr.bf16.mxu0 %v1028_v18 }
  0x2f   :  { %950 = vmatpush3.bf16.msra.mxu0 %v1020_v3 }
  0x32   :  { %987 = vmatmul.mubr.msk.bf16.gmra.mxu0 %vm177_vm0, %v1029_v19 }
  0x33   :  { %990 = vmatprep.mubr.msk.bf16.mxu0 %vm177_vm0, %v1030_v17 }
  0x3a   :  { %991 = vmatmul.mubr.msk.bf16.gmra.mxu0 %vm177_vm0, %v1031_v16 }
  0x3b   :  { %994 = vmatprep.mubr.msk.bf16.mxu0 %vm177_vm0, %v1032_v15 }
  0x42   :  { %995 = vmatmul.mubr.msk.bf16.gmra.mxu0 %vm177_vm0, %v1033_v13 }
  0x43   :  { %998 = vmatprep.mubr.msk.bf16.mxu0 %vm177_vm0, %v1034_v9 }
  0x4a   :  { %999 = vmatmul.mubr.msk.bf16.gmra.mxu0 %vm177_vm0, %v1035_v7 }
  0xd2   :  { %v1170_v21 = vpop.f32.mrf.mxu0 }
  0xd4   :  { %v1174_v22 = vpop.f32.mrf.mxu0 }
  0xd6   :  { %v1176_v23 = vpop.f32.mrf.mxu0 }
  0xd8   :  { %v1178_v24 = vpop.f32.mrf.mxu0 }
  0xda   :  { %v1180_v25 = vpop.f32.mrf.mxu0 }
  0xdc   :  { %v1182_v26 = vpop.f32.mrf.mxu0 }
  0xde   :  { %v1184_v27 = vpop.f32.mrf.mxu0 }
  0xe0   :  { %v1186_v28 = vpop.f32.mrf.mxu0 }
  0xe2   :  { %v980_v29 = vpop.f32.mrf.mxu0 }
  0xe3   :  { %v301_v10 = vadd.f32 %v980_v29, %v1207_v51 }
  0xe4   :  { %v1188_v30 = vpop.f32.mrf.mxu0 }
  0xe5   :  { %v397_v14 = vmax.f32 %v301_v10, 0.0  ;;  %v293_v18 = vadd.f32 %v1207_v51, %v1188_v30  ;;  %v285_v30 = vadd.f32 %v1180_v25, %v1207_v51  ;;  %v277_v25 = vadd.f32 %v1207_v51, %v1182_v26 }
  0xe6   :  { %v981_v31 = vpop.f32.mrf.mxu0  ;;  %v269_v26 = vadd.f32 %v1170_v21, %v1207_v51  ;;  %v261_v21 = vadd.f32 %v1207_v51, %v1174_v22 }
  0xe7   :  { %v304_v6 = vadd.f32 %v981_v31, %v1207_v51 }
  0xe8   :  { %v295_v32 = vpop.f32.mrf.mxu0 }
  0xe9   :  { %v398_v11 = vmax.f32 %v304_v6, 0.0  ;;  %v296_v15 = vadd.f32 %v1207_v51, %v295_v32  ;;  %v288_v32 = vadd.f32 %v1184_v27, %v1207_v51  ;;  %v393_v27 = vmax.f32 %v285_v30, 0.0 }
  0xea   :  { %v984_v33 = vpop.f32.mrf.mxu0  ;;  %v1052_v30 = vmov 0.0  }
  0xeb   :  { %v317_v58 = vadd.f32 %v984_v33, %v1207_v51  ;;  %v396_v19 = vmax.f32 %v296_v15, 0.0  ;;  %v395_v33 = vmax.f32 %v293_v18, 0.0 }
  0xec   :  { %v308_v34 = vpop.f32.mrf.mxu0 }
  0xed   :  { %v401_v62 = vmax.f32 %v317_v58, 0.0  ;;  %v309_v2 = vadd.f32 %v1207_v51, %v308_v34  ;;  %v387_v58 = vmax.f32 %v261_v21, 0.0 }
  0xee   :  { %v985_v35 = vpop.f32.mrf.mxu0 }
  0xef   :  { %v320_v52 = vadd.f32 %v985_v35, %v1207_v51  ;;  %v399_v7 = vmax.f32 %v309_v2, 0.0 }
  0xf0   :  { %v311_v36 = vpop.f32.mrf.mxu0 }
  0xf1   :  { %v402_v59 = vmax.f32 %v320_v52, 0.0  ;;  %v312_v63 = vadd.f32 %v1207_v51, %v311_v36  ;;  %v394_v36 = vmax.f32 %v288_v32, 0.0 }
  0xf2   :  { %v1190_v37 = vpop.f32.mrf.mxu0 }
  0xf3   :  { %v400_v3 = vmax.f32 %v312_v63, 0.0 }
  0xf4   :  { %v1192_v38 = vpop.f32.mrf.mxu0 }
  0xf6   :  { %v1194_v39 = vpop.f32.mrf.mxu0 }
  0xf8   :  { %v1196_v40 = vpop.f32.mrf.mxu0 }
  0xfa   :  { %v1198_v41 = vpop.f32.mrf.mxu0 }
  0xfb   :  { %v349_v34 = vadd.f32 %v1198_v41, %v1207_v51  ;;  %v280_v41 = vadd.f32 %v1207_v51, %v1186_v28  ;;  %v272_v28 = vadd.f32 %v1176_v23, %v1207_v51  ;;  %v389_v23 = vmax.f32 %v269_v26, 0.0 }
  0xfc   :  { %v1200_v42 = vpop.f32.mrf.mxu0 }
  0xfe   :  { %v993_v43 = vpop.f32.mrf.mxu0 }
  0xff   :  { %v352_v29 = vadd.f32 %v993_v43, %v1207_v51  ;;  %v409_v43 = vmax.f32 %v349_v34, 0.0 }
 0x100   :  { %v1202_v44 = vpop.f32.mrf.mxu0 }
 0x101   :  { %v410_v35 = vmax.f32 %v352_v29, 0.0 }
 0x102   :  { %v996_v45 = vpop.f32.mrf.mxu0 }
 0x103   :  { %v365_v8 = vadd.f32 %v996_v45, %v1207_v51  ;;  %v344_v45 = vadd.f32 %v1207_v51, %v1202_v44  ;;  %v392_v44 = vmax.f32 %v280_v41, 0.0 }
 0x104   :  { %v356_v46 = vpop.f32.mrf.mxu0 }
 0x105   :  { %v413_v12 = vmax.f32 %v365_v8, 0.0  ;;  %v357_v16 = vadd.f32 %v1207_v51, %v356_v46  ;;  %v341_v46 = vadd.f32 %v1207_v51, %v1200_v42  ;;  %v391_v42 = vmax.f32 %v277_v25, 0.0 }
 0x106   :  { %v997_v47 = vpop.f32.mrf.mxu0 }
 0x107   :  { %v368_v4 = vadd.f32 %v997_v47, %v1207_v51  ;;  %v411_v31 = vmax.f32 %v357_v16, 0.0  ;;  %v408_v47 = vmax.f32 %v344_v45, 0.0 }
 0x108   :  { %v359_v48 = vpop.f32.mrf.mxu0 }
 0x109   :  { %v414_v9 = vmax.f32 %v368_v4, 0.0  ;;  %v360_v13 = vadd.f32 %v1207_v51, %v359_v48  ;;  %v336_v48 = vadd.f32 %v1194_v39, %v1207_v51  ;;  %v390_v39 = vmax.f32 %v272_v28, 0.0  ;;  %v1037_v28 = vld [vmem:[%s1317_s4 + $0x10] sm:$0xff]  }
 0x10a   :  { %v1000_v49 = vpop.f32.mrf.mxu0 }
 0x10b   :  { %v381_v54 = vadd.f32 %v1000_v49, %v1207_v51  ;;  %v412_v17 = vmax.f32 %v360_v13, 0.0  ;;  %v407_v49 = vmax.f32 %v341_v46, 0.0  ;;  %v406_v52 = vmax.f32 %v336_v48, 0.0 }
 0x10c   :  { %v372_v50 = vpop.f32.mrf.mxu0 }
 0x10d   :  { %v417_v60 = vmax.f32 %v381_v54, 0.0  ;;  %v373_v0 = vadd.f32 %v1207_v51, %v372_v50  ;;  %v333_v50 = vadd.f32 %v1190_v37, %v1207_v51  ;;  %v328_v54 = vadd.f32 %v1207_v51, %v1196_v40 }
 0x10e   :  { %v1001_v53 = vpop.f32.mrf.mxu0  ;;  %v264_v37 = vadd.f32 %v1207_v51, %v1178_v24  ;;  %v591_v24 = vlaneseq }
 0x10f   :  { %v384_v55 = vadd.f32 %v1001_v53, %v1207_v51  ;;  %v415_v5 = vmax.f32 %v373_v0, 0.0  ;;  %v405_v53 = vmax.f32 %v333_v50, 0.0  ;;  %v1039_v50 = vld [vmem:[%s1317_s4] sm:$0xff]  }
 0x110   :  { %v375_v56 = vpop.f32.mrf.mxu0  ;;  %v388_v40 = vmax.f32 %v264_v37, 0.0 }
 0x111   :  { %v418_v57 = vmax.f32 %v384_v55, 0.0  ;;  %v376_v61 = vadd.f32 %v1207_v51, %v375_v56  ;;  %v325_v55 = vadd.f32 %v1207_v51, %v1192_v38  ;;  %v404_v56 = vmax.f32 %v328_v54, 0.0 }
 0x112   :  { %v595_v38 = vshrl.u32 %v591_v24, 7 }
 0x113   :  { %901 = vmatprep.subr.msk.mxu1 %vm420_vm1, %v418_v57  ;;  %v416_v1 = vmax.f32 %v376_v61, 0.0  ;;  %v403_v57 = vmax.f32 %v325_v55, 0.0 }
 0x114   :  { %902 = vmatpush3.xpose.msk.msra.mxu1 %vm420_vm1, %v402_v59  ;;  %v597_v59 = vmul.u32 16, %v595_v38  ;;  %v596_v61 = vadd.s32 8, %v595_v38  ;;  %v615_v51 = vsub.s32 0, %v595_v38 }
 0x115   :  { %903 = vmatprep.subr.msk.mxu1 %vm420_vm1, %v417_v60  ;;  %v592_v60 = vand.u32 127, %v591_v24 }
 0x116   :  { %v598_v22 = vmul.u32 16, %v596_v61 }
 0x117   :  { %v593_v63 = vadd.s32 128, %v592_v60  ;;  %vm599_vm2 = vcmp.ge.s32.totalorder %v592_v60, %v597_v59 }
 0x118   :  { %904 = vmatpush3.xpose.msk.msra.mxu1 %vm420_vm1, %v401_v62  ;;  %v603_v62 = vadd.s32 16, %v597_v59  ;;  %v604_v0 = vadd.s32 16, %v598_v22  ;;  %vm601_vm10 = vcmp.ge.s32.totalorder %v592_v60, %v598_v22 }
 0x119   :  { %905 = vmatprep.subr.msk.mxu1 %vm420_vm1, %v416_v1  ;;  %vm600_vm4 = vcmp.ge.s32.totalorder %v593_v63, %v597_v59  ;;  %vm602_vm7 = vcmp.ge.s32.totalorder %v593_v63, %v598_v22 }
 0x11a   :  { %vm605_vm3 = vcmp.lt.s32.totalorder %v592_v60, %v603_v62  ;;  %vm606_vm5 = vcmp.lt.s32.totalorder %v593_v63, %v603_v62  ;;  %vm608_vm8 = vcmp.lt.s32.totalorder %v593_v63, %v604_v0  ;;  %vm607_vm11 = vcmp.lt.s32.totalorder %v592_v60, %v604_v0 }
 0x11b   :  { %vm609_vm6 = vmand %vm599_vm2, %vm605_vm3 }
 0x11c   :  { %906 = vmatpush3.xpose.msk.msra.mxu1 %vm420_vm1, %v400_v3  ;;  %vm610_vm9 = vmand %vm600_vm4, %vm606_vm5 }
 0x11d   :  { %907 = vmatprep.subr.msk.mxu1 %vm420_vm1, %v415_v5  ;;  %vm612_vm12 = vmand %vm602_vm7, %vm608_vm8 }
 0x11e   :  { %vm611_vm13 = vmand %vm601_vm10, %vm607_vm11 }
 0x120   :  { %908 = vmatpush3.xpose.msk.msra.mxu1 %vm420_vm1, %v399_v7 }
 0x121   :  { %909 = vmatprep.subr.msk.mxu1 %vm420_vm1, %v414_v9 }
 0x124   :  { %910 = vmatpush3.xpose.msk.msra.mxu1 %vm420_vm1, %v398_v11 }
 0x125   :  { %911 = vmatprep.subr.msk.mxu1 %vm420_vm1, %v413_v12 }
 0x128   :  { %912 = vmatpush3.xpose.msk.msra.mxu1 %vm420_vm1, %v397_v14 }
 0x129   :  { %913 = vmatprep.subr.msk.mxu1 %vm420_vm1, %v412_v17 }
 0x12c   :  { %914 = vmatpush3.xpose.msk.msra.mxu1 %vm420_vm1, %v396_v19 }
 0x12d   :  { %915 = vmatprep.subr.msk.mxu1 %vm420_vm1, %v411_v31 }
 0x130   :  { %916 = vmatpush3.xpose.msk.msra.mxu1 %vm420_vm1, %v395_v33 }
 0x131   :  { %917 = vmatprep.subr.msk.mxu1 %vm420_vm1, %v410_v35 }
 0x134   :  { %918 = vmatpush3.xpose.msk.msra.mxu1 %vm420_vm1, %v394_v36  ;;  %v1036_v36 = vld [vmem:[%s1317_s4 + $0x18] sm:$0xff]  }
 0x135   :  { %919 = vmatprep.subr.msk.mxu1 %vm420_vm1, %v409_v43 }
 0x138   :  { %920 = vmatpush3.xpose.msk.msra.mxu1 %vm420_vm1, %v393_v27 }
 0x139   :  { %921 = vmatprep.subr.msk.mxu1 %vm420_vm1, %v408_v47 }
 0x13c   :  { %922 = vmatpush3.xpose.msk.msra.mxu1 %vm420_vm1, %v392_v44 }
 0x13d   :  { %923 = vmatprep.subr.msk.mxu1 %vm420_vm1, %v407_v49 }
 0x140   :  { %924 = vmatpush3.xpose.msk.msra.mxu1 %vm420_vm1, %v391_v42  ;;  %v1038_v42 = vld [vmem:[%s1317_s4 + $0x8] sm:$0xff]  }
 0x141   :  { %925 = vmatprep.subr.msk.mxu1 %vm420_vm1, %v406_v52  ;;  %v11_v52 = vstv %s1318_s5 }
 0x142   :  { %12 = vst [vmem:[#allocation2] sm:$0x1] %v11_v52 }
 0x144   :  { %926 = vmatpush3.xpose.msk.msra.mxu1 %vm420_vm1, %v390_v39 }
 0x145   :  { %927 = vmatprep.subr.msk.mxu1 %vm420_vm1, %v405_v53 }
 0x148   :  { %928 = vmatpush3.xpose.msk.msra.mxu1 %vm420_vm1, %v389_v23 }
 0x149   :  { %929 = vmatprep.subr.msk.mxu1 %vm420_vm1, %v404_v56  ;;  %v875_v56 = vld [vmem:[#allocation2] ss:$0 sm:$0xff] }
 0x14c   :  { %930 = vmatpush3.xpose.msk.msra.mxu1 %vm420_vm1, %v388_v40 }
 0x14d   :  { %931 = vmatprep.subr.msk.mxu1 %vm420_vm1, %v403_v57 }
 0x150   :  { %932 = vmatpush3.xpose.msk.msra.mxu1 %vm420_vm1, %v387_v58 }
 0x151   :  { %1002 = vmatprep.subr.bf16.mxu1 %v1052_v30 }
 0x153   :  { %934 = vmatmul.mubr.msk.f32.vlgmr.msra.gmra.mxu1 %vm420_vm1, %v1168_v20 }
 0x154   :  { %1003 = vmatpush3.bf16.msra.mxu1 %v1036_v36  ;;  %1010 = vmatprep.mubr.msk.bf16.mxu1 %vm1053_vm14, %v1052_v30 }
 0x155   :  { %1004 = vmatprep.subr.bf16.mxu1 %v1052_v30 }
 0x158   :  { %1005 = vmatpush3.bf16.msra.mxu1 %v1037_v28 }
 0x159   :  { %1006 = vmatprep.subr.bf16.mxu1 %v1052_v30 }
 0x15c   :  { %1007 = vmatpush3.bf16.msra.mxu1 %v1038_v42 }
 0x15d   :  { %1008 = vmatprep.subr.bf16.mxu1 %v1052_v30 }
 0x160   :  { %1009 = vmatpush3.bf16.msra.mxu1 %v1039_v50 }
 0x213   :  { %v586_v1 = vpop.f32.mrf.mxu1 }
 0x214   :  { %v616_v2 = vrot.slane %v586_v1, %v615_v51 }
 0x215   :  { %v588_v20 = vpop.f32.mrf.mxu1 }
 0x216   :  { %v620_v3 = vrot.slane %v588_v20, %v615_v51  ;;  %v621_v4 = vsel %vm609_vm6, %v616_v2, -inf  ;;  %v623_v8 = vsel %vm611_vm13, %v616_v2, -inf }
 0x218   :  { %v622_v5 = vsel %vm610_vm9, %v620_v3, -inf  ;;  %v624_v7 = vsel %vm612_vm12, %v620_v3, -inf }
 0x219   :  { %v625_v6 = vmax.f32 %v621_v4, %v622_v5  ;;  %v628_v9 = vmax.f32 %v623_v8, %v624_v7 }
 0x21b   :  { %626 = vmax.xlane.f32.xlu0 %v625_v6 }
 0x21f   :  { %629 = vmax.xlane.f32.xlu0 %v628_v9 }
 0x2a4   :  { %v627_v10 = vpop.xlane.xlu0 %626 }
 0x2a5   :  { %v631_v11 = vsub.f32 %v621_v4, %v627_v10  ;;  %v632_v12 = vsub.f32 %v622_v5, %v627_v10 }
 0x2a7   :  { %v635_v13 = vmul.f32 1.442695, %v631_v11  ;;  %v637_v14 = vmul.f32 1.442695, %v632_v12 }
 0x2a8   :  { %v630_v15 = vpop.xlane.xlu0 %629 }
 0x2a9   :  { %1040 = vpow2.f32 %v635_v13  ;;  %v633_v16 = vsub.f32 %v623_v8, %v630_v15  ;;  %v634_v17 = vsub.f32 %v624_v7, %v630_v15 }
 0x2aa   :  { %1042 = vpow2.f32 %v637_v14 }
 0x2ab   :  { %v639_v18 = vmul.f32 1.442695, %v633_v16  ;;  %v641_v19 = vmul.f32 1.442695, %v634_v17 }
 0x2ad   :  { %1044 = vpow2.f32 %v639_v18 }
 0x2ae   :  { %1046 = vpow2.f32 %v641_v19 }
 0x2b6   :  { %v1041_v29 = vpop.eup %1040 }
 0x2b7   :  { %v1043_v31 = vpop.eup %1042 }
 0x2b8   :  { %v643_v32 = vadd.f32 %v1043_v31, %v1041_v29 }
 0x2ba   :  { %v1045_v33 = vpop.eup %1044  ;;  %644 = vadd.xlane.f32.xlu1 %v643_v32 }
 0x2bb   :  { %v1047_v34 = vpop.eup %1046 }
 0x2bc   :  { %v646_v35 = vadd.f32 %v1047_v34, %v1045_v33 }
 0x2be   :  { %647 = vadd.xlane.f32.xlu1 %v646_v35 }
 0x343   :  { %v645_v43 = vpop.xlane.xlu1 %644 }
 0x344   :  { %1048 = vrcp.f32 %v645_v43 }
 0x347   :  { %v648_v45 = vpop.xlane.xlu1 %647 }
 0x348   :  { %1050 = vrcp.f32 %v648_v45 }
 0x351   :  { %v1049_v27 = vpop.eup %1048 }
 0x352   :  { %v652_v47 = vmul.f32 %v1049_v27, %v1043_v31  ;;  %v651_v44 = vmul.f32 %v1049_v27, %v1041_v29 }
 0x355   :  { %v1051_v41 = vpop.eup %1050 }
 0x356   :  { %v653_v46 = vmul.f32 %v1051_v41, %v1045_v33  ;;  %v654_v25 = vmul.f32 %v1051_v41, %v1047_v34 }
 0x358   :  { %v656_v48 = vpack.c.bf16 %v654_v25, %v652_v47  ;;  %v655_v49 = vpack.c.bf16 %v653_v46, %v651_v44 }
 0x35a   :  { %705 = vmatprep.mubr.bf16.mxu0 %v656_v48 }
 0x35b   :  { %706 = vmatmul.mubr.bf16.vlgmr.msra.gmra.mxu0 %v655_v49 }
 0x41b   :  { %v951_v26 = vpop.f32.mrf.mxu0 }
 0x41d   :  { %v952_v39 = vpop.f32.mrf.mxu0 }
 0x41e   :  { %v953_v23 = vadd.f32 %v952_v39, %v951_v26 }
 0x41f   :  { %v954_v53 = vpop.f32.mrf.mxu0 }
 0x421   :  { %v955_v54 = vpop.f32.mrf.mxu0 }
 0x422   :  { %v956_v37 = vadd.f32 %v955_v54, %v954_v53 }
 0x424   :  { %v722_v55 = vpack.c.bf16 %v956_v37, %v953_v23 }
 0x426   :  { %1011 = vmatmul.mubr.msk.bf16.vlgmr.msra.gmra.mxu1 %vm177_vm0, %v722_v55 }
 0x4e6   :  { %v791_v21 = vpop.f32.mrf.mxu1 }
 0x4e7   :  { %v792_v40 = vadd.f32 %v875_v56, %v791_v21 }
 0x4e8   :  { %v1012_v57 = vpop.f32.mrf.mxu1 }
 0x4e9   :  { %799 = vst.msk [vmem:[%s1319_s6] sm:$0xff] %vm798_vm15, %v792_v40 }
 0x4ea   :  { %v794_v58 = vpop.f32.mrf.mxu1 }
 0x4eb   :  { %v795_v24 = vadd.f32 %v875_v56, %v794_v58 }
 0x4ec   :  { %v1013_v38 = vpop.f32.mrf.mxu1 }
 0x4ed   :  { %800 = vst.msk [vmem:[%s1319_s6 + $0x8] sm:$0xff] %vm798_vm15, %v795_v24 }

// kernel: tpu_custom_call.1
= control target key start
LH: loop header
LB: loop body
LE: loop exit
PB: predicated region body
PF: predicated region fallthrough
CT: control target
= control target key end

     0   :  { %vm177_vm0 = vcmask 523264   ;;  %vm420_vm1 = vcmask 261120   ;;  %vm1053_vm14 = vmmov 0   ;;  %vm798_vm15 = vcmask 7168   ;;  %s1313_s1 = inlined_call_operand.vmem [shape: bf16[64,32], index: 1, kind: input, shape index: {}]   ;;  %s1314_s0 = inlined_call_operand.vmem [shape: bf16[256,64], index: 0, kind: input, shape index: {}]   ;;  %s1315_s3 = inlined_call_operand.vmem [shape: f32[1,32], index: 3, kind: input, shape index: {}]   ;;  %s1316_s2 = inlined_call_operand.vmem [shape: f32[1,32], index: 2, kind: input, shape index: {}]   ;;  %s1317_s4 = inlined_call_operand.vmem [shape: bf16[64,1], index: 4, kind: input, shape index: {}]   ;;  %s1318_s5 = inlined_call_operand.<no memory space> [shape: f32[1,1], index: 5, kind: input, shape index: {}]   ;;  %s1319_s6 = inlined_call_operand.vmem [shape: f32[16,1], index: 6, kind: output, shape index: {}]  }
   0x1   :  { %v1016_v0 = vld [vmem:[%s1313_s1 + $0x18] sm:$0xff]   ;;  %v1017_v1 = vld [vmem:[%s1313_s1 + $0x10] sm:$0xff]   ;;  %v1018_v2 = vld [vmem:[%s1313_s1 + $0x8] sm:$0xff]  }
   0x2   :  { %962 = vmatprep.subr.bf16.mxu0 %v1016_v0  ;;  %v1020_v3 = vld [vmem:[%s1314_s0] sm:$0xff]   ;;  %v1021_v5 = vld [vmem:[%s1314_s0 + $0x8] sm:$0xff]   ;;  %v1022_v6 = vld [vmem:[%s1314_s0 + $0x10] sm:$0xff]  }
   0x3   :  { %963 = vmatpush3.bf16.msra.mxu0 %v1016_v0  ;;  %970 = vmatprep.mubr.msk.bf16.mxu0 %vm177_vm0, %v1020_v3  ;;  %v1019_v4 = vld [vmem:[%s1313_s1] sm:$0xff]   ;;  %v1035_v7 = vld [vmem:[%s1314_s0 + $0x78] sm:$0xff]   ;;  %v1034_v9 = vld [vmem:[%s1314_s0 + $0x70] sm:$0xff]  }
   0x4   :  { %964 = vmatprep.subr.bf16.mxu0 %v1017_v1  ;;  %v1027_v8 = vld [vmem:[%s1314_s0 + $0x38] sm:$0xff]   ;;  %v1024_v11 = vld [vmem:[%s1314_s0 + $0x20] sm:$0xff]   ;;  %v1026_v12 = vld [vmem:[%s1314_s0 + $0x30] sm:$0xff]  }
   0x5   :  { %v1023_v10 = vld [vmem:[%s1314_s0 + $0x18] sm:$0xff]   ;;  %v1033_v13 = vld [vmem:[%s1314_s0 + $0x68] sm:$0xff]   ;;  %v1032_v15 = vld [vmem:[%s1314_s0 + $0x60] sm:$0xff]  }
   0x6   :  { %v1025_v14 = vld [vmem:[%s1314_s0 + $0x28] sm:$0xff]   ;;  %v1031_v16 = vld [vmem:[%s1314_s0 + $0x58] sm:$0xff]   ;;  %v1030_v17 = vld [vmem:[%s1314_s0 + $0x50] sm:$0xff]  }
   0x7   :  { %965 = vmatpush3.bf16.msra.mxu0 %v1017_v1  ;;  %v1028_v18 = vld [vmem:[%s1314_s0 + $0x40] sm:$0xff]   ;;  %v1029_v19 = vld [vmem:[%s1314_s0 + $0x48] sm:$0xff]  }
   0x8   :  { %966 = vmatprep.subr.bf16.mxu0 %v1018_v2  ;;  %v1168_v20 = vld [vmem:[%s1315_s3] sm:$0x1] }
   0x9   :  { %933 = vmatprep.mubr.msk.f32.mxu1 %vm420_vm1, %v1168_v20  ;;  %v1207_v51 = vld [vmem:[%s1316_s2] ss:$0 sm:$0xff] }
   0xb   :  { %967 = vmatpush3.bf16.msra.mxu0 %v1018_v2 }
   0xc   :  { %968 = vmatprep.subr.bf16.mxu0 %v1019_v4 }
   0xf   :  { %969 = vmatpush3.bf16.msra.mxu0 %v1019_v4 }
  0x10   :  { %935 = vmatprep.subr.bf16.mxu0 %v1035_v7 }
  0x12   :  { %971 = vmatmul.mubr.msk.bf16.vlgmr.msra.gmra.mxu0 %vm177_vm0, %v1021_v5 }
  0x13   :  { %974 = vmatprep.mubr.msk.bf16.mxu0 %vm177_vm0, %v1022_v6  ;;  %936 = vmatpush3.bf16.msra.mxu0 %v1027_v8 }
  0x14   :  { %937 = vmatprep.subr.bf16.mxu0 %v1034_v9 }
  0x17   :  { %938 = vmatpush3.bf16.msra.mxu0 %v1026_v12 }
  0x18   :  { %939 = vmatprep.subr.bf16.mxu0 %v1033_v13 }
  0x1a   :  { %975 = vmatmul.mubr.msk.bf16.gmra.mxu0 %vm177_vm0, %v1023_v10 }
  0x1b   :  { %978 = vmatprep.mubr.msk.bf16.mxu0 %vm177_vm0, %v1024_v11  ;;  %940 = vmatpush3.bf16.msra.mxu0 %v1025_v14 }
  0x1c   :  { %941 = vmatprep.subr.bf16.mxu0 %v1032_v15 }
  0x1f   :  { %942 = vmatpush3.bf16.msra.mxu0 %v1024_v11 }
  0x20   :  { %943 = vmatprep.subr.bf16.mxu0 %v1031_v16 }
  0x22   :  { %979 = vmatmul.mubr.msk.bf16.gmra.mxu0 %vm177_vm0, %v1025_v14 }
  0x23   :  { %982 = vmatprep.mubr.msk.bf16.mxu0 %vm177_vm0, %v1026_v12  ;;  %944 = vmatpush3.bf16.msra.mxu0 %v1023_v10 }
  0x24   :  { %945 = vmatprep.subr.bf16.mxu0 %v1030_v17 }
  0x27   :  { %946 = vmatpush3.bf16.msra.mxu0 %v1022_v6 }
  0x28   :  { %947 = vmatprep.subr.bf16.mxu0 %v1029_v19 }
  0x2a   :  { %983 = vmatmul.mubr.msk.bf16.gmra.mxu0 %vm177_vm0, %v1027_v8 }
  0x2b   :  { %986 = vmatprep.mubr.msk.bf16.mxu0 %vm177_vm0, %v1028_v18  ;;  %948 = vmatpush3.bf16.msra.mxu0 %v1021_v5 }
  0x2c   :  { %949 = vmatprep.subr.bf16.mxu0 %v1028_v18 }
  0x2f   :  { %950 = vmatpush3.bf16.msra.mxu0 %v1020_v3 }
  0x32   :  { %987 = vmatmul.mubr.msk.bf16.gmra.mxu0 %vm177_vm0, %v1029_v19 }
  0x33   :  { %990 = vmatprep.mubr.msk.bf16.mxu0 %vm177_vm0, %v1030_v17 }
  0x3a   :  { %991 = vmatmul.mubr.msk.bf16.gmra.mxu0 %vm177_vm0, %v1031_v16 }
  0x3b   :  { %994 = vmatprep.mubr.msk.bf16.mxu0 %vm177_vm0, %v1032_v15 }
  0x42   :  { %995 = vmatmul.mubr.msk.bf16.gmra.mxu0 %vm177_vm0, %v1033_v13 }
  0x43   :  { %998 = vmatprep.mubr.msk.bf16.mxu0 %vm177_vm0, %v1034_v9 }
  0x4a   :  { %999 = vmatmul.mubr.msk.bf16.gmra.mxu0 %vm177_vm0, %v1035_v7 }
  0xd2   :  { %v1170_v21 = vpop.f32.mrf.mxu0 }
  0xd4   :  { %v1174_v22 = vpop.f32.mrf.mxu0 }
  0xd6   :  { %v1176_v23 = vpop.f32.mrf.mxu0 }
  0xd8   :  { %v1178_v24 = vpop.f32.mrf.mxu0 }
  0xda   :  { %v1180_v25 = vpop.f32.mrf.mxu0 }
  0xdc   :  { %v1182_v26 = vpop.f32.mrf.mxu0 }
  0xde   :  { %v1184_v27 = vpop.f32.mrf.mxu0 }
  0xe0   :  { %v1186_v28 = vpop.f32.mrf.mxu0 }
  0xe2   :  { %v980_v29 = vpop.f32.mrf.mxu0 }
  0xe3   :  { %v301_v10 = vadd.f32 %v980_v29, %v1207_v51 }
  0xe4   :  { %v1188_v30 = vpop.f32.mrf.mxu0 }
  0xe5   :  { %v397_v14 = vmax.f32 %v301_v10, 0.0  ;;  %v293_v18 = vadd.f32 %v1207_v51, %v1188_v30  ;;  %v285_v30 = vadd.f32 %v1180_v25, %v1207_v51  ;;  %v277_v25 = vadd.f32 %v1207_v51, %v1182_v26 }
  0xe6   :  { %v981_v31 = vpop.f32.mrf.mxu0  ;;  %v269_v26 = vadd.f32 %v1170_v21, %v1207_v51  ;;  %v261_v21 = vadd.f32 %v1207_v51, %v1174_v22 }
  0xe7   :  { %v304_v6 = vadd.f32 %v981_v31, %v1207_v51 }
  0xe8   :  { %v295_v32 = vpop.f32.mrf.mxu0 }
  0xe9   :  { %v398_v11 = vmax.f32 %v304_v6, 0.0  ;;  %v296_v15 = vadd.f32 %v1207_v51, %v295_v32  ;;  %v288_v32 = vadd.f32 %v1184_v27, %v1207_v51  ;;  %v393_v27 = vmax.f32 %v285_v30, 0.0 }
  0xea   :  { %v984_v33 = vpop.f32.mrf.mxu0  ;;  %v1052_v30 = vmov 0.0  }
  0xeb   :  { %v317_v58 = vadd.f32 %v984_v33, %v1207_v51  ;;  %v396_v19 = vmax.f32 %v296_v15, 0.0  ;;  %v395_v33 = vmax.f32 %v293_v18, 0.0 }
  0xec   :  { %v308_v34 = vpop.f32.mrf.mxu0 }
  0xed   :  { %v401_v62 = vmax.f32 %v317_v58, 0.0  ;;  %v309_v2 = vadd.f32 %v1207_v51, %v308_v34  ;;  %v387_v58 = vmax.f32 %v261_v21, 0.0 }
  0xee   :  { %v985_v35 = vpop.f32.mrf.mxu0 }
  0xef   :  { %v320_v52 = vadd.f32 %v985_v35, %v1207_v51  ;;  %v399_v7 = vmax.f32 %v309_v2, 0.0 }
  0xf0   :  { %v311_v36 = vpop.f32.mrf.mxu0 }
  0xf1   :  { %v402_v59 = vmax.f32 %v320_v52, 0.0  ;;  %v312_v63 = vadd.f32 %v1207_v51, %v311_v36  ;;  %v394_v36 = vmax.f32 %v288_v32, 0.0 }
  0xf2   :  { %v1190_v37 = vpop.f32.mrf.mxu0 }
  0xf3   :  { %v400_v3 = vmax.f32 %v312_v63, 0.0 }
  0xf4   :  { %v1192_v38 = vpop.f32.mrf.mxu0 }
  0xf6   :  { %v1194_v39 = vpop.f32.mrf.mxu0 }
  0xf8   :  { %v1196_v40 = vpop.f32.mrf.mxu0 }
  0xfa   :  { %v1198_v41 = vpop.f32.mrf.mxu0 }
  0xfb   :  { %v349_v34 = vadd.f32 %v1198_v41, %v1207_v51  ;;  %v280_v41 = vadd.f32 %v1207_v51, %v1186_v28  ;;  %v272_v28 = vadd.f32 %v1176_v23, %v1207_v51  ;;  %v389_v23 = vmax.f32 %v269_v26, 0.0 }
  0xfc   :  { %v1200_v42 = vpop.f32.mrf.mxu0 }
  0xfe   :  { %v993_v43 = vpop.f32.mrf.mxu0 }
  0xff   :  { %v352_v29 = vadd.f32 %v993_v43, %v1207_v51  ;;  %v409_v43 = vmax.f32 %v349_v34, 0.0 }
 0x100   :  { %v1202_v44 = vpop.f32.mrf.mxu0 }
 0x101   :  { %v410_v35 = vmax.f32 %v352_v29, 0.0 }
 0x102   :  { %v996_v45 = vpop.f32.mrf.mxu0 }
 0x103   :  { %v365_v8 = vadd.f32 %v996_v45, %v1207_v51  ;;  %v344_v45 = vadd.f32 %v1207_v51, %v1202_v44  ;;  %v392_v44 = vmax.f32 %v280_v41, 0.0 }
 0x104   :  { %v356_v46 = vpop.f32.mrf.mxu0 }
 0x105   :  { %v413_v12 = vmax.f32 %v365_v8, 0.0  ;;  %v357_v16 = vadd.f32 %v1207_v51, %v356_v46  ;;  %v341_v46 = vadd.f32 %v1207_v51, %v1200_v42  ;;  %v391_v42 = vmax.f32 %v277_v25, 0.0 }
 0x106   :  { %v997_v47 = vpop.f32.mrf.mxu0 }
 0x107   :  { %v368_v4 = vadd.f32 %v997_v47, %v1207_v51  ;;  %v411_v31 = vmax.f32 %v357_v16, 0.0  ;;  %v408_v47 = vmax.f32 %v344_v45, 0.0 }
 0x108   :  { %v359_v48 = vpop.f32.mrf.mxu0 }
 0x109   :  { %v414_v9 = vmax.f32 %v368_v4, 0.0  ;;  %v360_v13 = vadd.f32 %v1207_v51, %v359_v48  ;;  %v336_v48 = vadd.f32 %v1194_v39, %v1207_v51  ;;  %v390_v39 = vmax.f32 %v272_v28, 0.0  ;;  %v1037_v28 = vld [vmem:[%s1317_s4 + $0x10] sm:$0xff]  }
 0x10a   :  { %v1000_v49 = vpop.f32.mrf.mxu0 }
 0x10b   :  { %v381_v54 = vadd.f32 %v1000_v49, %v1207_v51  ;;  %v412_v17 = vmax.f32 %v360_v13, 0.0  ;;  %v407_v49 = vmax.f32 %v341_v46, 0.0  ;;  %v406_v52 = vmax.f32 %v336_v48, 0.0 }
 0x10c   :  { %v372_v50 = vpop.f32.mrf.mxu0 }
 0x10d   :  { %v417_v60 = vmax.f32 %v381_v54, 0.0  ;;  %v373_v0 = vadd.f32 %v1207_v51, %v372_v50  ;;  %v333_v50 = vadd.f32 %v1190_v37, %v1207_v51  ;;  %v328_v54 = vadd.f32 %v1207_v51, %v1196_v40 }
 0x10e   :  { %v1001_v53 = vpop.f32.mrf.mxu0  ;;  %v264_v37 = vadd.f32 %v1207_v51, %v1178_v24  ;;  %v591_v24 = vlaneseq }
 0x10f   :  { %v384_v55 = vadd.f32 %v1001_v53, %v1207_v51  ;;  %v415_v5 = vmax.f32 %v373_v0, 0.0  ;;  %v405_v53 = vmax.f32 %v333_v50, 0.0  ;;  %v1039_v50 = vld [vmem:[%s1317_s4] sm:$0xff]  }
 0x110   :  { %v375_v56 = vpop.f32.mrf.mxu0  ;;  %v388_v40 = vmax.f32 %v264_v37, 0.0 }
 0x111   :  { %v418_v57 = vmax.f32 %v384_v55, 0.0  ;;  %v376_v61 = vadd.f32 %v1207_v51, %v375_v56  ;;  %v325_v55 = vadd.f32 %v1207_v51, %v1192_v38  ;;  %v404_v56 = vmax.f32 %v328_v54, 0.0 }
 0x112   :  { %v595_v38 = vshrl.u32 %v591_v24, 7 }
 0x113   :  { %901 = vmatprep.subr.msk.mxu1 %vm420_vm1, %v418_v57  ;;  %v416_v1 = vmax.f32 %v376_v61, 0.0  ;;  %v403_v57 = vmax.f32 %v325_v55, 0.0 }
 0x114   :  { %902 = vmatpush3.xpose.msk.msra.mxu1 %vm420_vm1, %v402_v59  ;;  %v597_v59 = vmul.u32 16, %v595_v38  ;;  %v596_v61 = vadd.s32 8, %v595_v38  ;;  %v615_v51 = vsub.s32 0, %v595_v38 }
 0x115   :  { %903 = vmatprep.subr.msk.mxu1 %vm420_vm1, %v417_v60  ;;  %v592_v60 = vand.u32 127, %v591_v24 }
 0x116   :  { %v598_v22 = vmul.u32 16, %v596_v61 }
 0x117   :  { %v593_v63 = vadd.s32 128, %v592_v60  ;;  %vm599_vm2 = vcmp.ge.s32.totalorder %v592_v60, %v597_v59 }
 0x118   :  { %904 = vmatpush3.xpose.msk.msra.mxu1 %vm420_vm1, %v401_v62  ;;  %v603_v62 = vadd.s32 16, %v597_v59  ;;  %v604_v0 = vadd.s32 16, %v598_v22  ;;  %vm601_vm10 = vcmp.ge.s32.totalorder %v592_v60, %v598_v22 }
 0x119   :  { %905 = vmatprep.subr.msk.mxu1 %vm420_vm1, %v416_v1  ;;  %vm600_vm4 = vcmp.ge.s32.totalorder %v593_v63, %v597_v59  ;;  %vm602_vm7 = vcmp.ge.s32.totalorder %v593_v63, %v598_v22 }
 0x11a   :  { %vm605_vm3 = vcmp.lt.s32.totalorder %v592_v60, %v603_v62  ;;  %vm606_vm5 = vcmp.lt.s32.totalorder %v593_v63, %v603_v62  ;;  %vm608_vm8 = vcmp.lt.s32.totalorder %v593_v63, %v604_v0  ;;  %vm607_vm11 = vcmp.lt.s32.totalorder %v592_v60, %v604_v0 }
 0x11b   :  { %vm609_vm6 = vmand %vm599_vm2, %vm605_vm3 }
 0x11c   :  { %906 = vmatpush3.xpose.msk.msra.mxu1 %vm420_vm1, %v400_v3  ;;  %vm610_vm9 = vmand %vm600_vm4, %vm606_vm5 }
 0x11d   :  { %907 = vmatprep.subr.msk.mxu1 %vm420_vm1, %v415_v5  ;;  %vm612_vm12 = vmand %vm602_vm7, %vm608_vm8 }
 0x11e   :  { %vm611_vm13 = vmand %vm601_vm10, %vm607_vm11 }
 0x120   :  { %908 = vmatpush3.xpose.msk.msra.mxu1 %vm420_vm1, %v399_v7 }
 0x121   :  { %909 = vmatprep.subr.msk.mxu1 %vm420_vm1, %v414_v9 }
 0x124   :  { %910 = vmatpush3.xpose.msk.msra.mxu1 %vm420_vm1, %v398_v11 }
 0x125   :  { %911 = vmatprep.subr.msk.mxu1 %vm420_vm1, %v413_v12 }
 0x128   :  { %912 = vmatpush3.xpose.msk.msra.mxu1 %vm420_vm1, %v397_v14 }
 0x129   :  { %913 = vmatprep.subr.msk.mxu1 %vm420_vm1, %v412_v17 }
 0x12c   :  { %914 = vmatpush3.xpose.msk.msra.mxu1 %vm420_vm1, %v396_v19 }
 0x12d   :  { %915 = vmatprep.subr.msk.mxu1 %vm420_vm1, %v411_v31 }
 0x130   :  { %916 = vmatpush3.xpose.msk.msra.mxu1 %vm420_vm1, %v395_v33 }
 0x131   :  { %917 = vmatprep.subr.msk.mxu1 %vm420_vm1, %v410_v35 }
 0x134   :  { %918 = vmatpush3.xpose.msk.msra.mxu1 %vm420_vm1, %v394_v36  ;;  %v1036_v36 = vld [vmem:[%s1317_s4 + $0x18] sm:$0xff]  }
 0x135   :  { %919 = vmatprep.subr.msk.mxu1 %vm420_vm1, %v409_v43 }
 0x138   :  { %920 = vmatpush3.xpose.msk.msra.mxu1 %vm420_vm1, %v393_v27 }
 0x139   :  { %921 = vmatprep.subr.msk.mxu1 %vm420_vm1, %v408_v47 }
 0x13c   :  { %922 = vmatpush3.xpose.msk.msra.mxu1 %vm420_vm1, %v392_v44 }
 0x13d   :  { %923 = vmatprep.subr.msk.mxu1 %vm420_vm1, %v407_v49 }
 0x140   :  { %924 = vmatpush3.xpose.msk.msra.mxu1 %vm420_vm1, %v391_v42  ;;  %v1038_v42 = vld [vmem:[%s1317_s4 + $0x8] sm:$0xff]  }
 0x141   :  { %925 = vmatprep.subr.msk.mxu1 %vm420_vm1, %v406_v52  ;;  %v11_v52 = vstv %s1318_s5 }
 0x142   :  { %12 = vst [vmem:[#allocation2] sm:$0x1] %v11_v52 }
 0x144   :  { %926 = vmatpush3.xpose.msk.msra.mxu1 %vm420_vm1, %v390_v39 }
 0x145   :  { %927 = vmatprep.subr.msk.mxu1 %vm420_vm1, %v405_v53 }
 0x148   :  { %928 = vmatpush3.xpose.msk.msra.mxu1 %vm420_vm1, %v389_v23 }
 0x149   :  { %929 = vmatprep.subr.msk.mxu1 %vm420_vm1, %v404_v56  ;;  %v875_v56 = vld [vmem:[#allocation2] ss:$0 sm:$0xff] }
 0x14c   :  { %930 = vmatpush3.xpose.msk.msra.mxu1 %vm420_vm1, %v388_v40 }
 0x14d   :  { %931 = vmatprep.subr.msk.mxu1 %vm420_vm1, %v403_v57 }
 0x150   :  { %932 = vmatpush3.xpose.msk.msra.mxu1 %vm420_vm1, %v387_v58 }
 0x151   :  { %1002 = vmatprep.subr.bf16.mxu1 %v1052_v30 }
 0x153   :  { %934 = vmatmul.mubr.msk.f32.vlgmr.msra.gmra.mxu1 %vm420_vm1, %v1168_v20 }
 0x154   :  { %1003 = vmatpush3.bf16.msra.mxu1 %v1036_v36  ;;  %1010 = vmatprep.mubr.msk.bf16.mxu1 %vm1053_vm14, %v1052_v30 }
 0x155   :  { %1004 = vmatprep.subr.bf16.mxu1 %v1052_v30 }
 0x158   :  { %1005 = vmatpush3.bf16.msra.mxu1 %v1037_v28 }
 0x159   :  { %1006 = vmatprep.subr.bf16.mxu1 %v1052_v30 }
 0x15c   :  { %1007 = vmatpush3.bf16.msra.mxu1 %v1038_v42 }
 0x15d   :  { %1008 = vmatprep.subr.bf16.mxu1 %v1052_v30 }
 0x160   :  { %1009 = vmatpush3.bf16.msra.mxu1 %v1039_v50 }
 0x213   :  { %v586_v1 = vpop.f32.mrf.mxu1 }
 0x214   :  { %v616_v2 = vrot.slane %v586_v1, %v615_v51 }
 0x215   :  { %v588_v20 = vpop.f32.mrf.mxu1 }
 0x216   :  { %v620_v3 = vrot.slane %v588_v20, %v615_v51  ;;  %v621_v4 = vsel %vm609_vm6, %v616_v2, -inf  ;;  %v623_v8 = vsel %vm611_vm13, %v616_v2, -inf }
 0x218   :  { %v622_v5 = vsel %vm610_vm9, %v620_v3, -inf  ;;  %v624_v7 = vsel %vm612_vm12, %v620_v3, -inf }
 0x219   :  { %v625_v6 = vmax.f32 %v621_v4, %v622_v5  ;;  %v628_v9 = vmax.f32 %v623_v8, %v624_v7 }
 0x21b   :  { %626 = vmax.xlane.f32.xlu0 %v625_v6 }
 0x21f   :  { %629 = vmax.xlane.f32.xlu0 %v628_v9 }
 0x2a4   :  { %v627_v10 = vpop.xlane.xlu0 %626 }
 0x2a5   :  { %v631_v11 = vsub.f32 %v621_v4, %v627_v10  ;;  %v632_v12 = vsub.f32 %v622_v5, %v627_v10 }
 0x2a7   :  { %v635_v13 = vmul.f32 1.442695, %v631_v11  ;;  %v637_v14 = vmul.f32 1.442695, %v632_v12 }
 0x2a8   :  { %v630_v15 = vpop.xlane.xlu0 %629 }
 0x2a9   :  { %1040 = vpow2.f32 %v635_v13  ;;  %v633_v16 = vsub.f32 %v623_v8, %v630_v15  ;;  %v634_v17 = vsub.f32 %v624_v7, %v630_v15 }
 0x2aa   :  { %1042 = vpow2.f32 %v637_v14 }
 0x2ab   :  { %v639_v18 = vmul.f32 1.442695, %v633_v16  ;;  %v641_v19 = vmul.f32 1.442695, %v634_v17 }
 0x2ad   :  { %1044 = vpow2.f32 %v639_v18 }
 0x2ae   :  { %1046 = vpow2.f32 %v641_v19 }
 0x2b6   :  { %v1041_v29 = vpop.eup %1040 }
 0x2b7   :  { %v1043_v31 = vpop.eup %1042 }
 0x2b8   :  { %v643_v32 = vadd.f32 %v1043_v31, %v1041_v29 }
 0x2ba   :  { %v1045_v33 = vpop.eup %1044  ;;  %644 = vadd.xlane.f32.xlu1 %v643_v32 }
 0x2bb   :  { %v1047_v34 = vpop.eup %1046 }
 0x2bc   :  { %v646_v35 = vadd.f32 %v1047_v34, %v1045_v33 }
 0x2be   :  { %647 = vadd.xlane.f32.xlu1 %v646_v35 }
 0x343   :  { %v645_v43 = vpop.xlane.xlu1 %644 }
 0x344   :  { %1048 = vrcp.f32 %v645_v43 }
 0x347   :  { %v648_v45 = vpop.xlane.xlu1 %647 }
 0x348   :  { %1050 = vrcp.f32 %v648_v45 }
 0x351   :  { %v1049_v27 = vpop.eup %1048 }
 0x352   :  { %v652_v47 = vmul.f32 %v1049_v27, %v1043_v31  ;;  %v651_v44 = vmul.f32 %v1049_v27, %v1041_v29 }
 0x355   :  { %v1051_v41 = vpop.eup %1050 }
 0x356   :  { %v653_v46 = vmul.f32 %v1051_v41, %v1045_v33  ;;  %v654_v25 = vmul.f32 %v1051_v41, %v1047_v34 }
 0x358   :  { %v656_v48 = vpack.c.bf16 %v654_v25, %v652_v47  ;;  %v655_v49 = vpack.c.bf16 %v653_v46, %v651_v44 }
 0x35a   :  { %705 = vmatprep.mubr.bf16.mxu0 %v656_v48 }
 0x35b   :  { %706 = vmatmul.mubr.bf16.vlgmr.msra.gmra.mxu0 %v655_v49 }
 0x41b   :  { %v951_v26 = vpop.f32.mrf.mxu0 }
 0x41d   :  { %v952_v39 = vpop.f32.mrf.mxu0 }
 0x41e   :  { %v953_v23 = vadd.f32 %v952_v39, %v951_v26 }
 0x41f   :  { %v954_v53 = vpop.f32.mrf.mxu0 }
 0x421   :  { %v955_v54 = vpop.f32.mrf.mxu0 }
 0x422   :  { %v956_v37 = vadd.f32 %v955_v54, %v954_v53 }
 0x424   :  { %v722_v55 = vpack.c.bf16 %v956_v37, %v953_v23 }
 0x426   :  { %1011 = vmatmul.mubr.msk.bf16.vlgmr.msra.gmra.mxu1 %vm177_vm0, %v722_v55 }
 0x4e6   :  { %v791_v21 = vpop.f32.mrf.mxu1 }
 0x4e7   :  { %v792_v40 = vadd.f32 %v875_v56, %v791_v21 }
 0x4e8   :  { %v1012_v57 = vpop.f32.mrf.mxu1 }
 0x4e9   :  { %799 = vst.msk [vmem:[%s1319_s6] sm:$0xff] %vm798_vm15, %v792_v40 }
 0x4ea   :  { %v794_v58 = vpop.f32.mrf.mxu1 }
 0x4eb   :  { %v795_v24 = vadd.f32 %v875_v56, %v794_v58 }
 0x4ec   :  { %v1013_v38 = vpop.f32.mrf.mxu1 }
 0x4ed   :  { %800 = vst.msk [vmem:[%s1319_s6 + $0x8] sm:$0xff] %vm798_vm15, %v795_v24 }

</bundles_post_ra>
